<compile_context>
chip_gen: v6e
topology: v6e:2x2x1
jax: 0.10.0
libtpu: 0.0.40
codegen_flags: <defaults>
</compile_context>

<pallas_src>
import functools

import jax
import jax.numpy as jnp
from jax.experimental import pallas as pl
from jax.experimental.pallas import tpu as pltpu


def _round_up(x, m):
    return ((x + m - 1) // m) * m


def _mlp_decoder_kernel(q_ref, idx_ref, w1q_ref, latw1_ref, b1_ref,
                        w2_ref, b2_ref, w3_ref, b3_ref, w4_ref, b4_ref,
                        o_ref):
    """One row tile: fused latent gather + 4-layer MLP (Linear + ReLU each)."""
    q = q_ref[...]                          # (T, Q*3)    f32
    idx = idx_ref[...]                      # (T, 1)      int32

    # latent[batch] @ W1_latent realized as onehot @ (latent @ W1_latent):
    # latW1 is precomputed in the wrapper, so the gather + latent matmul
    # collapse into one tiny K=Bpad MXU pass (padded rows never match).
    t = idx.shape[0]
    b_pad = latw1_ref.shape[0]
    onehot = (idx == jax.lax.broadcasted_iota(jnp.int32, (t, b_pad), 1)
              ).astype(jnp.float32)                                   # (T, Bpad)

    # Layer 1: concat([q, latent[batch]]) @ W1 == q @ W1_q + onehot @ latW1
    h = (jnp.dot(q, w1q_ref[...], preferred_element_type=jnp.float32)
         + jnp.dot(onehot, latw1_ref[...], preferred_element_type=jnp.float32)
         + b1_ref[...])
    h = jnp.maximum(h, 0.0)

    h = jnp.dot(h, w2_ref[...], preferred_element_type=jnp.float32) + b2_ref[...]
    h = jnp.maximum(h, 0.0)

    h = jnp.dot(h, w3_ref[...], preferred_element_type=jnp.float32) + b3_ref[...]
    h = jnp.maximum(h, 0.0)

    # Final layer kept lane-narrow (out_dim columns) so the store is a single
    # contiguous (T, out_dim) write -- no padded 128-wide output stream.
    h = jnp.dot(h, w4_ref[...], preferred_element_type=jnp.float32) + b4_ref[...]
    h = jnp.maximum(h, 0.0)

    o_ref[...] = h.astype(o_ref.dtype)


@functools.partial(jax.jit, static_argnames=("tile_rows",))
def mlp_decoder_forward(latent, queries, batch, params, *, tile_rows=2048):
    """latent: (B, L), queries: (N, Q, 3), batch: (N,) int.  Returns (N, L)."""
    n = queries.shape[0]
    b_lat, latent_dim = latent.shape
    q3 = queries.shape[1] * queries.shape[2]

    (w1, b1), (w2, b2), (w3, b3), (w4, b4) = params
    out_dim = w4.shape[1]

    # Lane-pad hidden widths to multiples of 128 (zero cols/rows keep the math
    # exact because ReLU(0) = 0 and the padded K-rows are zero).  The output
    # layer keeps its true width so the store is narrow & contiguous.
    h1 = _round_up(w1.shape[1], 128)
    h2 = _round_up(w2.shape[1], 128)
    h3 = _round_up(w3.shape[1], 128)

    def pad_to(a, rows, cols):
        return jnp.pad(a, ((0, rows - a.shape[0]), (0, cols - a.shape[1])))

    # Split layer-1 weight; fold the latent table through its half of W1 once.
    w1q = pad_to(w1[:q3], q3, h1)                                  # (Q*3, h1)
    b1p = pad_to(b1, 1, h1)
    w2p = pad_to(w2, h1, h2)
    b2p = pad_to(b2, 1, h2)
    w3p = pad_to(w3, h2, h3)
    b3p = pad_to(b3, 1, h3)
    w4p = pad_to(w4, h3, out_dim)                                  # (h3, L)
    b4p = b4                                                       # (1, L)

    # Sublane-pad the (tiny) latent table and pre-project it through W1_latent;
    # padded rows project to zero and are never selected by the one-hot.
    b_pad = _round_up(b_lat, 8)
    lat_p = jnp.pad(latent, ((0, b_pad - b_lat), (0, 0)))
    latw1 = jnp.dot(lat_p, pad_to(w1[q3:], latent_dim, h1),
                    preferred_element_type=jnp.float32)            # (Bpad, h1)

    q_flat = queries.reshape(n, q3)                    # free row-major reshape
    idx2d = batch.astype(jnp.int32).reshape(n, 1)

    # Row tile: big enough to amortize the ~0.35-0.6 us/step grid overhead,
    # small enough for v5e's 16 MiB scoped VMEM; clamp for tiny N; when N is
    # large, keep >= 4 grid steps so v7x's two TensorCores both get tiles and
    # the input/output double-buffering actually overlaps DMA with compute.
    n_pad = _round_up(n, 8)
    t = min(tile_rows, n_pad)
    min_steps = 4
    if n_pad >= min_steps * 256:
        t = min(t, _round_up(-(-n_pad // min_steps), 8))
    t = max(_round_up(t, 8), 8)
    grid = (pl.cdiv(n, t),)

    row_map = lambda i: (i, 0)
    full_map = lambda i: (0, 0)
    full = lambda shape: pl.BlockSpec(shape, full_map)

    flops = 2 * n * (q3 * h1 + b_pad * h1 + h1 * h2 + h2 * h3 + h3 * out_dim)
    bytes_accessed = 4 * (n * q3 + n + n * out_dim
                          + q3 * h1 + b_pad * h1 + h1
                          + h1 * h2 + h2
                          + h2 * h3 + h3
                          + h3 * out_dim + out_dim)

    return pl.pallas_call(
        _mlp_decoder_kernel,
        out_shape=jax.ShapeDtypeStruct((n, out_dim), jnp.float32),
        grid_spec=pltpu.PrefetchScalarGridSpec(
            num_scalar_prefetch=0,
            grid=grid,
            in_specs=[
                pl.BlockSpec((t, q3), row_map),        # query tile
                pl.BlockSpec((t, 1), row_map),         # batch-index tile
                full((q3, h1)),                        # W1 (query half)
                full((b_pad, h1)),                     # latent @ W1 (latent half)
                full((1, h1)),                         # b1
                full((h1, h2)), full((1, h2)),         # layer 2
                full((h2, h3)), full((1, h3)),         # layer 3
                full((h3, out_dim)), full((1, out_dim)),  # layer 4 (narrow)
            ],
            out_specs=pl.BlockSpec((t, out_dim), row_map),  # narrow output
        ),
        compiler_params=pltpu.CompilerParams(
            dimension_semantics=("parallel",)),
        cost_estimate=pl.CostEstimate(flops=flops, transcendentals=0,
                                      bytes_accessed=bytes_accessed),
    )(q_flat, idx2d, w1q, latw1, b1p, w2p, b2p, w3p, b3p, w4p, b4p)


def init_params(key, latent_dim, num_queries):
    """Deterministic Linear weights for MLP([Din, 4L, 4L, 2L, L])."""
    d_in = latent_dim + num_queries * 3
    dims = [d_in, latent_dim * 4, latent_dim * 4, latent_dim * 2, latent_dim]
    params = []
    for i in range(len(dims) - 1):
        key, kw, kb = jax.random.split(key, 3)
        fan_in = dims[i]
        scale = 1.0 / jnp.sqrt(jnp.float32(fan_in))
        w = jax.random.uniform(kw, (dims[i], dims[i + 1]), jnp.float32,
                               minval=-scale, maxval=scale)
        b = jax.random.uniform(kb, (1, dims[i + 1]), jnp.float32,
                               minval=-scale, maxval=scale)
        params.append((w, b))
    return params


def reference_forward(latent, queries, batch, params):
    """Pure-JAX reference of MLPDecoder.forward for correctness checking."""
    x = jnp.concatenate(
        [queries.reshape(queries.shape[0], -1), latent[batch]], axis=1)
    for (w, b) in params:
        x = jnp.maximum(x @ w + b, 0.0)
    return x


if __name__ == "__main__":
    latent_dim = 32
    num_queries = 8
    num_latents = 4       # "batch" of latent codes
    n_points = 16         # number of query sets

    key = jax.random.PRNGKey(0)
    k_lat, k_q, k_b, k_p = jax.random.split(key, 4)

    latent = jax.random.normal(k_lat, (num_latents, latent_dim), jnp.float32)
    queries = jax.random.normal(k_q, (n_points, num_queries, 3), jnp.float32)
    batch = jax.random.randint(k_b, (n_points,), 0, num_latents, jnp.int32)
    params = init_params(k_p, latent_dim, num_queries)

    out = mlp_decoder_forward(latent, queries, batch, params)
    out = jax.block_until_ready(out)

    ref = reference_forward(latent, queries, batch, params)
    assert out.shape == (n_points, latent_dim)
    assert jnp.allclose(out, ref, atol=1e-4, rtol=1e-4), \
        f"max abs err {jnp.max(jnp.abs(out - ref))}"

    print("KERNEL_OK")
</pallas_src>

<mosaic_0001>
module attributes {stable_mosaic.version = 11 : i64} {
  func.func @_mlp_decoder_kernel(%arg0: i32, %arg1: memref<16x24xf32, #tpu.memory_space<vmem>>, %arg2: memref<16x1xi32, #tpu.memory_space<vmem>>, %arg3: memref<24x128xf32, #tpu.memory_space<vmem>>, %arg4: memref<8x128xf32, #tpu.memory_space<vmem>>, %arg5: memref<1x128xf32, #tpu.memory_space<vmem>>, %arg6: memref<128x128xf32, #tpu.memory_space<vmem>>, %arg7: memref<1x128xf32, #tpu.memory_space<vmem>>, %arg8: memref<128x128xf32, #tpu.memory_space<vmem>>, %arg9: memref<1x128xf32, #tpu.memory_space<vmem>>, %arg10: memref<128x32xf32, #tpu.memory_space<vmem>>, %arg11: memref<1x32xf32, #tpu.memory_space<vmem>>, %arg12: memref<16x32xf32, #tpu.memory_space<vmem>>) attributes {dimension_semantics = [#tpu.dimension_semantics<parallel>], iteration_bounds = array<i64: 1>, scalar_prefetch = 0 : i64, scratch_operands = 0 : i64, tpu.core_type = #tpu.core_type<tc>, window_params = [{transform_indices = @transform_0, window_bounds = array<i64: 16, 24>}, {transform_indices = @transform_1, window_bounds = array<i64: 16, 1>}, {pipeline_mode = #tpu.pipeline_mode<synchronous>, transform_indices = @transform_2, window_bounds = array<i64: 24, 128>}, {pipeline_mode = #tpu.pipeline_mode<synchronous>, transform_indices = @transform_3, window_bounds = array<i64: 8, 128>}, {pipeline_mode = #tpu.pipeline_mode<synchronous>, transform_indices = @transform_4, window_bounds = array<i64: 1, 128>}, {pipeline_mode = #tpu.pipeline_mode<synchronous>, transform_indices = @transform_5, window_bounds = array<i64: 128, 128>}, {pipeline_mode = #tpu.pipeline_mode<synchronous>, transform_indices = @transform_6, window_bounds = array<i64: 1, 128>}, {pipeline_mode = #tpu.pipeline_mode<synchronous>, transform_indices = @transform_7, window_bounds = array<i64: 128, 128>}, {pipeline_mode = #tpu.pipeline_mode<synchronous>, transform_indices = @transform_8, window_bounds = array<i64: 1, 128>}, {pipeline_mode = #tpu.pipeline_mode<synchronous>, transform_indices = @transform_9, window_bounds = array<i64: 128, 32>}, {pipeline_mode = #tpu.pipeline_mode<synchronous>, transform_indices = @transform_10, window_bounds = array<i64: 1, 32>}, {transform_indices = @transform_11, window_bounds = array<i64: 16, 32>}]} {
    %c0 = arith.constant 0 : index
    %c0_0 = arith.constant 0 : index
    %0 = vector.load %arg1[%c0, %c0_0] : memref<16x24xf32, #tpu.memory_space<vmem>>, vector<16x24xf32>
    %c0_1 = arith.constant 0 : index
    %c0_2 = arith.constant 0 : index
    %1 = vector.load %arg2[%c0_1, %c0_2] : memref<16x1xi32, #tpu.memory_space<vmem>>, vector<16x1xi32>
    %2 = tpu.iota {dimensions = array<i32: 1>} : vector<16x8xi32>
    %3 = vector.broadcast %1 : vector<16x1xi32> to vector<16x8xi32>
    %4 = arith.cmpi eq, %3, %2 : vector<16x8xi32>
    %5 = arith.extui %4 : vector<16x8xi1> to vector<16x8xi32>
    %6 = arith.sitofp %5 : vector<16x8xi32> to vector<16x8xf32>
    %c0_3 = arith.constant 0 : index
    %c0_4 = arith.constant 0 : index
    %7 = vector.load %arg3[%c0_3, %c0_4] : memref<24x128xf32, #tpu.memory_space<vmem>>, vector<24x128xf32>
    %cst = arith.constant dense<0.000000e+00> : vector<16x128xf32>
    %8 = tpu.matmul %0, %7, %cst {dimension_numbers = #tpu.dot_dimension_numbers<[1], [0], [0], [1], [0, 0, 1, 1], [], []>} : vector<16x24xf32>, vector<24x128xf32>, vector<16x128xf32> -> vector<16x128xf32>
    %c0_5 = arith.constant 0 : index
    %c0_6 = arith.constant 0 : index
    %9 = vector.load %arg4[%c0_5, %c0_6] : memref<8x128xf32, #tpu.memory_space<vmem>>, vector<8x128xf32>
    %cst_7 = arith.constant dense<0.000000e+00> : vector<16x128xf32>
    %10 = tpu.matmul %6, %9, %cst_7 {dimension_numbers = #tpu.dot_dimension_numbers<[1], [0], [0], [1], [0, 0, 1, 1], [], []>} : vector<16x8xf32>, vector<8x128xf32>, vector<16x128xf32> -> vector<16x128xf32>
    %11 = arith.addf %8, %10 : vector<16x128xf32>
    %c0_8 = arith.constant 0 : index
    %c0_9 = arith.constant 0 : index
    %12 = vector.load %arg5[%c0_8, %c0_9] : memref<1x128xf32, #tpu.memory_space<vmem>>, vector<1x128xf32>
    %13 = vector.broadcast %12 : vector<1x128xf32> to vector<16x128xf32>
    %14 = arith.addf %11, %13 : vector<16x128xf32>
    %cst_10 = arith.constant 0.000000e+00 : f32
    %15 = vector.broadcast %cst_10 : f32 to vector<16x128xf32>
    %16 = arith.maximumf %14, %15 : vector<16x128xf32>
    %c0_11 = arith.constant 0 : index
    %c0_12 = arith.constant 0 : index
    %17 = vector.load %arg6[%c0_11, %c0_12] : memref<128x128xf32, #tpu.memory_space<vmem>>, vector<128x128xf32>
    %cst_13 = arith.constant dense<0.000000e+00> : vector<16x128xf32>
    %18 = tpu.matmul %16, %17, %cst_13 {dimension_numbers = #tpu.dot_dimension_numbers<[1], [0], [0], [1], [0, 0, 1, 1], [], []>} : vector<16x128xf32>, vector<128x128xf32>, vector<16x128xf32> -> vector<16x128xf32>
    %c0_14 = arith.constant 0 : index
    %c0_15 = arith.constant 0 : index
    %19 = vector.load %arg7[%c0_14, %c0_15] : memref<1x128xf32, #tpu.memory_space<vmem>>, vector<1x128xf32>
    %20 = vector.broadcast %19 : vector<1x128xf32> to vector<16x128xf32>
    %21 = arith.addf %18, %20 : vector<16x128xf32>
    %cst_16 = arith.constant 0.000000e+00 : f32
    %22 = vector.broadcast %cst_16 : f32 to vector<16x128xf32>
    %23 = arith.maximumf %21, %22 : vector<16x128xf32>
    %c0_17 = arith.constant 0 : index
    %c0_18 = arith.constant 0 : index
    %24 = vector.load %arg8[%c0_17, %c0_18] : memref<128x128xf32, #tpu.memory_space<vmem>>, vector<128x128xf32>
    %cst_19 = arith.constant dense<0.000000e+00> : vector<16x128xf32>
    %25 = tpu.matmul %23, %24, %cst_19 {dimension_numbers = #tpu.dot_dimension_numbers<[1], [0], [0], [1], [0, 0, 1, 1], [], []>} : vector<16x128xf32>, vector<128x128xf32>, vector<16x128xf32> -> vector<16x128xf32>
    %c0_20 = arith.constant 0 : index
    %c0_21 = arith.constant 0 : index
    %26 = vector.load %arg9[%c0_20, %c0_21] : memref<1x128xf32, #tpu.memory_space<vmem>>, vector<1x128xf32>
    %27 = vector.broadcast %26 : vector<1x128xf32> to vector<16x128xf32>
    %28 = arith.addf %25, %27 : vector<16x128xf32>
    %cst_22 = arith.constant 0.000000e+00 : f32
    %29 = vector.broadcast %cst_22 : f32 to vector<16x128xf32>
    %30 = arith.maximumf %28, %29 : vector<16x128xf32>
    %c0_23 = arith.constant 0 : index
    %c0_24 = arith.constant 0 : index
    %31 = vector.load %arg10[%c0_23, %c0_24] : memref<128x32xf32, #tpu.memory_space<vmem>>, vector<128x32xf32>
    %cst_25 = arith.constant dense<0.000000e+00> : vector<16x32xf32>
    %32 = tpu.matmul %30, %31, %cst_25 {dimension_numbers = #tpu.dot_dimension_numbers<[1], [0], [0], [1], [0, 0, 1, 1], [], []>} : vector<16x128xf32>, vector<128x32xf32>, vector<16x32xf32> -> vector<16x32xf32>
    %c0_26 = arith.constant 0 : index
    %c0_27 = arith.constant 0 : index
    %33 = vector.load %arg11[%c0_26, %c0_27] : memref<1x32xf32, #tpu.memory_space<vmem>>, vector<1x32xf32>
    %34 = vector.broadcast %33 : vector<1x32xf32> to vector<16x32xf32>
    %35 = arith.addf %32, %34 : vector<16x32xf32>
    %cst_28 = arith.constant 0.000000e+00 : f32
    %36 = vector.broadcast %cst_28 : f32 to vector<16x32xf32>
    %37 = arith.maximumf %35, %36 : vector<16x32xf32>
    %c0_29 = arith.constant 0 : index
    %c0_30 = arith.constant 0 : index
    %38 = vector.load %arg12[%c0_29, %c0_30] : memref<16x32xf32, #tpu.memory_space<vmem>>, vector<16x32xf32>
    tpu.vector_store %arg12[%c0_29, %c0_30], %37 {strides = array<i32>} : memref<16x32xf32, #tpu.memory_space<vmem>>, vector<16x32xf32>,
    return
  }
  func.func @transform_0(%arg0: i32) -> (i32, i32) {
    %c0_i32 = arith.constant 0 : i32
    %c0_i32_0 = arith.constant 0 : i32
    return %arg0, %c0_i32 : i32, i32
  }
  func.func @transform_1(%arg0: i32) -> (i32, i32) {
    %c0_i32 = arith.constant 0 : i32
    %c0_i32_0 = arith.constant 0 : i32
    return %arg0, %c0_i32 : i32, i32
  }
  func.func @transform_2(%arg0: i32) -> (i32, i32) {
    %c0_i32 = arith.constant 0 : i32
    %c0_i32_0 = arith.constant 0 : i32
    %c0_i32_1 = arith.constant 0 : i32
    return %c0_i32, %c0_i32_0 : i32, i32
  }
  func.func @transform_3(%arg0: i32) -> (i32, i32) {
    %c0_i32 = arith.constant 0 : i32
    %c0_i32_0 = arith.constant 0 : i32
    %c0_i32_1 = arith.constant 0 : i32
    return %c0_i32, %c0_i32_0 : i32, i32
  }
  func.func @transform_4(%arg0: i32) -> (i32, i32) {
    %c0_i32 = arith.constant 0 : i32
    %c0_i32_0 = arith.constant 0 : i32
    %c0_i32_1 = arith.constant 0 : i32
    return %c0_i32, %c0_i32_0 : i32, i32
  }
  func.func @transform_5(%arg0: i32) -> (i32, i32) {
    %c0_i32 = arith.constant 0 : i32
    %c0_i32_0 = arith.constant 0 : i32
    %c0_i32_1 = arith.constant 0 : i32
    return %c0_i32, %c0_i32_0 : i32, i32
  }
  func.func @transform_6(%arg0: i32) -> (i32, i32) {
    %c0_i32 = arith.constant 0 : i32
    %c0_i32_0 = arith.constant 0 : i32
    %c0_i32_1 = arith.constant 0 : i32
    return %c0_i32, %c0_i32_0 : i32, i32
  }
  func.func @transform_7(%arg0: i32) -> (i32, i32) {
    %c0_i32 = arith.constant 0 : i32
    %c0_i32_0 = arith.constant 0 : i32
    %c0_i32_1 = arith.constant 0 : i32
    return %c0_i32, %c0_i32_0 : i32, i32
  }
  func.func @transform_8(%arg0: i32) -> (i32, i32) {
    %c0_i32 = arith.constant 0 : i32
    %c0_i32_0 = arith.constant 0 : i32
    %c0_i32_1 = arith.constant 0 : i32
    return %c0_i32, %c0_i32_0 : i32, i32
  }
  func.func @transform_9(%arg0: i32) -> (i32, i32) {
    %c0_i32 = arith.constant 0 : i32
    %c0_i32_0 = arith.constant 0 : i32
    %c0_i32_1 = arith.constant 0 : i32
    return %c0_i32, %c0_i32_0 : i32, i32
  }
  func.func @transform_10(%arg0: i32) -> (i32, i32) {
    %c0_i32 = arith.constant 0 : i32
    %c0_i32_0 = arith.constant 0 : i32
    %c0_i32_1 = arith.constant 0 : i32
    return %c0_i32, %c0_i32_0 : i32, i32
  }
  func.func @transform_11(%arg0: i32) -> (i32, i32) {
    %c0_i32 = arith.constant 0 : i32
    %c0_i32_0 = arith.constant 0 : i32
    return %arg0, %c0_i32 : i32, i32
  }
}

</mosaic_0001>

<bundles_post_ra>
// kernel: mlp_decoder_forward.1
= control target key start
LH: loop header
LB: loop body
LE: loop exit
PB: predicated region body
PF: predicated region fallthrough
CT: control target
= control target key end

     0   :  { %v774_v2 = vmov 0   ;;  %s1022_s0 = inlined_call_operand.vmem [shape: f32[16,24], index: 0, kind: input, shape index: {}]   ;;  %s1023_s1 = inlined_call_operand.vmem [shape: s32[16,1], index: 1, kind: input, shape index: {}]   ;;  %s1024_s2 = inlined_call_operand.vmem [shape: f32[24,128], index: 2, kind: input, shape index: {}]   ;;  %s1025_s3 = inlined_call_operand.vmem [shape: f32[8,128], index: 3, kind: input, shape index: {}]   ;;  %s1026_s4 = inlined_call_operand.vmem [shape: f32[1,128], index: 4, kind: input, shape index: {}]   ;;  %s1027_s5 = inlined_call_operand.vmem [shape: f32[128,128], index: 5, kind: input, shape index: {}]   ;;  %s1028_s6 = inlined_call_operand.vmem [shape: f32[1,128], index: 6, kind: input, shape index: {}]   ;;  %s1029_s7 = inlined_call_operand.vmem [shape: f32[128,128], index: 7, kind: input, shape index: {}]   ;;  %s1030_s8 = inlined_call_operand.vmem [shape: f32[1,128], index: 8, kind: input, shape index: {}]   ;;  %s1031_s9 = inlined_call_operand.vmem [shape: f32[128,32], index: 9, kind: input, shape index: {}]   ;;  %s1032_s10 = inlined_call_operand.vmem [shape: f32[1,32], index: 10, kind: input, shape index: {}]   ;;  %s1033_s11 = inlined_call_operand.hbm [shape: f32[16,32], index: 11, kind: output, shape index: {}]  }
   0x1   :  { %v41_v0 = vld [vmem:[%s1023_s1] sm:$0xff]  ;;  %751 = vset.pattern.permute.xlu0 %v774_v2 }
   0x2   :  { %v60_v1 = vld [vmem:[%s1025_s3] sm:$0xff] }
   0x3   :  { %627 = vmatprep.subr.mxu1 %v60_v1 }
   0x4   :  { %16 = vsyncpa [#allocation3], 0  ;;  %46 = vperm.xlu0 %751, %v41_v0   ;;  %628 = vmatpush3.msra.mxu1 %v60_v1  ;;  %v59_v3 = vld [vmem:[%s1024_s2 + $0x10] sm:$0xff]  ;;  %v42_v4 = vld [vmem:[%s1023_s1 + $0x8] sm:$0xff]  ;;  %v43_v14 = vlaneseq  ;;  %vm61_vm0 = vcmask 64512   ;;  %v775_v17 = vmov 0.0  }
   0x5   :  { %632 = vmatprep.subr.mxu1 %v59_v3  ;;  %v251_v5 = vld [vmem:[%s1027_s5 + $0x78] sm:$0xff]  ;;  %v250_v6 = vld [vmem:[%s1027_s5 + $0x70] sm:$0xff]  ;;  %v249_v7 = vld [vmem:[%s1027_s5 + $0x68] sm:$0xff]  ;;  %vm143_vm3 = vcmask 195584   ;;  %vm536_vm4 = vcmask 261120  }
   0x6   :  { %641 = vmatprep.subr.mxu0 %v251_v5  ;;  %v248_v8 = vld [vmem:[%s1027_s5 + $0x60] sm:$0xff]  ;;  %v247_v9 = vld [vmem:[%s1027_s5 + $0x58] sm:$0xff]  ;;  %v246_v10 = vld [vmem:[%s1027_s5 + $0x50] sm:$0xff]  ;;  %v44_v15 = vand.u32 127, %v43_v14 }
   0x7   :  { %642 = vmatpush3.msra.mxu0 %v251_v5  ;;  %v245_v11 = vld [vmem:[%s1027_s5 + $0x48] sm:$0xff]  ;;  %v244_v12 = vld [vmem:[%s1027_s5 + $0x40] sm:$0xff]  ;;  %v243_v13 = vld [vmem:[%s1027_s5 + $0x38] sm:$0xff] }
   0x8   :  { %49 = vperm.xlu0 %751, %v42_v4   ;;  %643 = vmatprep.subr.mxu0 %v250_v6  ;;  %v39_v20 = vld [vmem:[%s1022_s0] sm:$0xff]  ;;  %v58_v22 = vld [vmem:[%s1024_s2 + $0x8] sm:$0xff]  ;;  %v242_v25 = vld [vmem:[%s1027_s5 + $0x30] sm:$0xff] }
   0x9   :  { %644 = vmatpush3.msra.mxu0 %v250_v6  ;;  %v57_v23 = vld [vmem:[%s1024_s2] sm:$0xff]  ;;  %v40_v24 = vld [vmem:[%s1022_s0 + $0x8] sm:$0xff]  ;;  %v239_v28 = vld [vmem:[%s1027_s5 + $0x18] sm:$0xff] }
   0xa   :  { %645 = vmatprep.subr.mxu0 %v249_v7  ;;  %v241_v26 = vld [vmem:[%s1027_s5 + $0x28] sm:$0xff]  ;;  %v240_v27 = vld [vmem:[%s1027_s5 + $0x20] sm:$0xff]  ;;  %v238_v29 = vld [vmem:[%s1027_s5 + $0x10] sm:$0xff] }
   0xb   :  { %646 = vmatpush3.msra.mxu0 %v249_v7  ;;  %v237_v30 = vld [vmem:[%s1027_s5 + $0x8] sm:$0xff]  ;;  %v236_v31 = vld [vmem:[%s1027_s5] sm:$0xff]  ;;  %v351_v32 = vld [vmem:[%s1029_s7 + $0x78] sm:$0xff] }
   0xc   :  { %647 = vmatprep.subr.mxu0 %v248_v8  ;;  %v350_v33 = vld [vmem:[%s1029_s7 + $0x70] sm:$0xff]  ;;  %v349_v34 = vld [vmem:[%s1029_s7 + $0x68] sm:$0xff]  ;;  %v348_v35 = vld [vmem:[%s1029_s7 + $0x60] sm:$0xff] }
   0xd   :  { %648 = vmatpush3.msra.mxu0 %v248_v8  ;;  %v347_v36 = vld [vmem:[%s1029_s7 + $0x58] sm:$0xff]  ;;  %v346_v37 = vld [vmem:[%s1029_s7 + $0x50] sm:$0xff]  ;;  %v345_v38 = vld [vmem:[%s1029_s7 + $0x48] sm:$0xff] }
   0xe   :  { %649 = vmatprep.subr.mxu0 %v247_v9  ;;  %v344_v39 = vld [vmem:[%s1029_s7 + $0x40] sm:$0xff]  ;;  %v343_v40 = vld [vmem:[%s1029_s7 + $0x38] sm:$0xff]  ;;  %v342_v41 = vld [vmem:[%s1029_s7 + $0x30] sm:$0xff] }
   0xf   :  { %650 = vmatpush3.msra.mxu0 %v247_v9  ;;  %v341_v42 = vld [vmem:[%s1029_s7 + $0x28] sm:$0xff]  ;;  %v340_v43 = vld [vmem:[%s1029_s7 + $0x20] sm:$0xff]  ;;  %v339_v55 = vld [vmem:[%s1029_s7 + $0x18] sm:$0xff] }
  0x10   :  { %651 = vmatprep.subr.mxu0 %v246_v10  ;;  %v561_v48 = vld [vmem:[%s1026_s4] ss:$0 sm:$0xff]  ;;  %v338_v56 = vld [vmem:[%s1029_s7 + $0x10] sm:$0xff]  ;;  %v337_v57 = vld [vmem:[%s1029_s7 + $0x8] sm:$0xff] }
  0x11   :  { %652 = vmatpush3.msra.mxu0 %v246_v10  ;;  %v336_v58 = vld [vmem:[%s1029_s7] sm:$0xff]  ;;  %v451_v59 = vld [vmem:[%s1031_s9 + $0x78] sm:$0xff]  ;;  %v450_v60 = vld [vmem:[%s1031_s9 + $0x70] sm:$0xff] }
  0x12   :  { %653 = vmatprep.subr.mxu0 %v245_v11  ;;  %v449_v61 = vld [vmem:[%s1031_s9 + $0x68] sm:$0xff]  ;;  %v448_v62 = vld [vmem:[%s1031_s9 + $0x60] sm:$0xff]  ;;  %v447_v63 = vld [vmem:[%s1031_s9 + $0x58] sm:$0xff] }
  0x13   :  { %654 = vmatpush3.msra.mxu0 %v245_v11  ;;  %v446_v0 = vld [vmem:[%s1031_s9 + $0x50] sm:$0xff]  ;;  %v445_v1 = vld [vmem:[%s1031_s9 + $0x48] sm:$0xff]  ;;  %v444_v2 = vld [vmem:[%s1031_s9 + $0x40] sm:$0xff] }
  0x14   :  { %655 = vmatprep.subr.mxu0 %v244_v12  ;;  %v442_v4 = vld [vmem:[%s1031_s9 + $0x30] sm:$0xff]  ;;  %v441_v5 = vld [vmem:[%s1031_s9 + $0x28] sm:$0xff]  ;;  %v440_v6 = vld [vmem:[%s1031_s9 + $0x20] sm:$0xff] }
  0x15   :  { %656 = vmatpush3.msra.mxu0 %v244_v12  ;;  %v562_v7 = vld [vmem:[%s1028_s6] ss:$0 sm:$0xff]  ;;  %v439_v14 = vld [vmem:[%s1031_s9 + $0x18] sm:$0xff] }
  0x16   :  { %657 = vmatprep.subr.mxu0 %v243_v13 }
  0x17   :  { %658 = vmatpush3.msra.mxu0 %v243_v13 }
  0x18   :  { %659 = vmatprep.subr.mxu0 %v242_v25 }
  0x19   :  { %660 = vmatpush3.msra.mxu0 %v242_v25  ;;  %v564_v25 = vld [vmem:[%s1032_s10] ss:$0 sm:$0xff] }
  0x1a   :  { %661 = vmatprep.subr.mxu0 %v241_v26 }
  0x1b   :  { %662 = vmatpush3.msra.mxu0 %v241_v26 }
  0x1c   :  { %663 = vmatprep.subr.mxu0 %v240_v27 }
  0x1d   :  { %664 = vmatpush3.msra.mxu0 %v240_v27 }
  0x1e   :  { %665 = vmatprep.subr.mxu0 %v239_v28 }
  0x1f   :  { %666 = vmatpush3.msra.mxu0 %v239_v28 }
  0x20   :  { %667 = vmatprep.subr.mxu0 %v238_v29 }
  0x21   :  { %668 = vmatpush3.msra.mxu0 %v238_v29 }
  0x22   :  { %669 = vmatprep.subr.mxu0 %v237_v30 }
  0x23   :  { %670 = vmatpush3.msra.mxu0 %v237_v30 }
  0x24   :  { %671 = vmatprep.subr.mxu0 %v236_v31 }
  0x25   :  { %672 = vmatpush3.msra.mxu0 %v236_v31 }
  0x26   :  { %711 = vmatprep.subr.mxu0 %v451_v59 }
  0x7f   :  { %v47_v16 = vpop.permute.xlu0 %46 }
  0x80   :  { %vm51_vm1 = vcmp.eq.s32.totalorder %v47_v16, %v44_v15  ;;  %v437_v16 = vld [vmem:[%s1031_s9 + $0x8] sm:$0xff] }
  0x81   :  { %v555_v18 = vsel %vm51_vm1, 1.0, %v775_v17 }
  0x82   :  { %629 = vmatprep.mubr.msk.f32.mxu1 %vm61_vm0, %v555_v18  ;;  %v563_v18 = vld [vmem:[%s1030_s8] ss:$0 sm:$0xff] }
  0x83   :  { %v50_v19 = vpop.permute.xlu0 %49 }
  0x84   :  { %vm52_vm2 = vcmp.eq.s32.totalorder %v50_v19, %v44_v15  ;;  %v438_v15 = vld [vmem:[%s1031_s9 + $0x10] sm:$0xff] }
  0x85   :  { %v556_v21 = vsel %vm52_vm2, 1.0, %v775_v17  ;;  %v436_v17 = vld [vmem:[%s1031_s9] sm:$0xff] }
  0x86   :  { %630 = vmatmul.mubr.msk.f32.vlgmr.msra.gmra.mxu1 %vm61_vm0, %v556_v21 }
  0x87   :  { %633 = vmatpush3.msra.mxu1 %v59_v3  ;;  %638 = vmatprep.mubr.msk.f32.mxu1 %vm143_vm3, %v39_v20  ;;  %v443_v3 = vld [vmem:[%s1031_s9 + $0x38] sm:$0xff]  ;;  %s776_s9 = smov [#allocation2]  }
  0x88   :  { %634 = vmatprep.subr.mxu1 %v58_v22  ;;  %s544_s16 = sshll.u32 %s776_s9, 4  ;;  %s545_s16 = int_to_ptr.vmem [resolvable:$true] %s544_s16 }
  0x89   :  { %635 = vmatpush3.msra.mxu1 %v58_v22  ;;  %s752_s8 = scalar_lea.vmem %s545_s16, 256  ;;  %p757_p1 = scmp.lt.s32.totalorder %s545_s16, %s545_s16 }
  0x8a   :  { %636 = vmatprep.subr.mxu1 %v57_v23  ;;  %p753_p0 = scmp.ne.s32.totalorder %s545_s16, %s752_s8  ;;  %p758_p2 = scmp.lt.s32.totalorder %s752_s8, %s752_s8 }
  0x8b   :  { %637 = vmatpush3.msra.mxu1 %v57_v23 }
  0x8c   :  { %639 = vmatmul.mubr.msk.f32.vlgmr.msra.gmra.mxu1 %vm143_vm3, %v40_v24  ;;  %676 = vmatprep.subr.mxu1 %v351_v32  ;;  %p759_p3 = por %p758_p2, %p757_p1 }
  0x8d   :  { %677 = vmatpush3.msra.mxu1 %v351_v32 }
  0x8e   :  { %678 = vmatprep.subr.mxu1 %v350_v33  ;;  %p760_p4 = pnand %p759_p3, %p753_p0 }
  0x8f   :  { %679 = vmatpush3.msra.mxu1 %v350_v33 }
  0x90   :  { %680 = vmatprep.subr.mxu1 %v349_v34 }
  0x91   :  { %681 = vmatpush3.msra.mxu1 %v349_v34 }
  0x92   :  { %682 = vmatprep.subr.mxu1 %v348_v35 }
  0x93   :  { %683 = vmatpush3.msra.mxu1 %v348_v35 }
  0x94   :  { %684 = vmatprep.subr.mxu1 %v347_v36 }
  0x95   :  { %685 = vmatpush3.msra.mxu1 %v347_v36 }
  0x96   :  { %686 = vmatprep.subr.mxu1 %v346_v37 }
  0x97   :  { %687 = vmatpush3.msra.mxu1 %v346_v37 }
  0x98   :  { %688 = vmatprep.subr.mxu1 %v345_v38 }
  0x99   :  { %689 = vmatpush3.msra.mxu1 %v345_v38 }
  0x9a   :  { %690 = vmatprep.subr.mxu1 %v344_v39 }
  0x9b   :  { %691 = vmatpush3.msra.mxu1 %v344_v39 }
  0x9c   :  { %692 = vmatprep.subr.mxu1 %v343_v40 }
  0x9d   :  { %693 = vmatpush3.msra.mxu1 %v343_v40 }
  0x9e   :  { %694 = vmatprep.subr.mxu1 %v342_v41 }
  0x9f   :  { %695 = vmatpush3.msra.mxu1 %v342_v41 }
  0xa0   :  { %696 = vmatprep.subr.mxu1 %v341_v42 }
  0xa1   :  { %697 = vmatpush3.msra.mxu1 %v341_v42 }
  0xa2   :  { %698 = vmatprep.subr.mxu1 %v340_v43 }
  0xa3   :  { %699 = vmatpush3.msra.mxu1 %v340_v43 }
  0xa4   :  { %700 = vmatprep.subr.mxu1 %v339_v55 }
  0xa5   :  { %701 = vmatpush3.msra.mxu1 %v339_v55 }
  0xa6   :  { %702 = vmatprep.subr.mxu1 %v338_v56 }
  0xa7   :  { %703 = vmatpush3.msra.mxu1 %v338_v56 }
  0xa8   :  { %704 = vmatprep.subr.mxu1 %v337_v57 }
  0xa9   :  { %705 = vmatpush3.msra.mxu1 %v337_v57 }
  0xaa   :  { %706 = vmatprep.subr.mxu1 %v336_v58 }
  0xab   :  { %707 = vmatpush3.msra.mxu1 %v336_v58 }
 0x146   :  { %v631_v44 = vpop.f32.mrf.mxu1 }
 0x148   :  { %v134_v45 = vpop.f32.mrf.mxu1 }
 0x14c   :  { %v640_v46 = vpop.f32.mrf.mxu1 }
 0x14d   :  { %v222_v47 = vadd.f32 %v640_v46, %v631_v44 }
 0x14e   :  { %v216_v49 = vpop.f32.mrf.mxu1 }
 0x14f   :  { %v217_v50 = vadd.f32 %v216_v49, %v134_v45  ;;  %v233_v51 = vadd.f32 %v561_v48, %v222_v47 }
 0x151   :  { %v232_v52 = vadd.f32 %v561_v48, %v217_v50  ;;  %v235_v54 = vmax.f32 %v233_v51, 0.0 }
 0x153   :  { %v234_v53 = vmax.f32 %v232_v52, 0.0 }
 0x155   :  { %673 = vmatprep.mubr.f32.mxu0 %v234_v53 }
 0x156   :  { %674 = vmatmul.mubr.f32.vlgmr.msra.gmra.mxu0 %v235_v54 }
 0x157   :  { %712 = vmatpush3.msra.mxu0 %v451_v59 }
 0x158   :  { %713 = vmatprep.subr.mxu0 %v450_v60 }
 0x159   :  { %714 = vmatpush3.msra.mxu0 %v450_v60 }
 0x15a   :  { %715 = vmatprep.subr.mxu0 %v449_v61 }
 0x15b   :  { %716 = vmatpush3.msra.mxu0 %v449_v61 }
 0x15c   :  { %717 = vmatprep.subr.mxu0 %v448_v62 }
 0x15d   :  { %718 = vmatpush3.msra.mxu0 %v448_v62 }
 0x15e   :  { %719 = vmatprep.subr.mxu0 %v447_v63 }
 0x15f   :  { %720 = vmatpush3.msra.mxu0 %v447_v63 }
 0x160   :  { %721 = vmatprep.subr.mxu0 %v446_v0 }
 0x161   :  { %722 = vmatpush3.msra.mxu0 %v446_v0 }
 0x162   :  { %723 = vmatprep.subr.mxu0 %v445_v1 }
 0x163   :  { %724 = vmatpush3.msra.mxu0 %v445_v1 }
 0x164   :  { %725 = vmatprep.subr.mxu0 %v444_v2 }
 0x165   :  { %726 = vmatpush3.msra.mxu0 %v444_v2 }
 0x166   :  { %727 = vmatprep.subr.mxu0 %v443_v3 }
 0x167   :  { %728 = vmatpush3.msra.mxu0 %v443_v3 }
 0x168   :  { %729 = vmatprep.subr.mxu0 %v442_v4 }
 0x169   :  { %730 = vmatpush3.msra.mxu0 %v442_v4 }
 0x16a   :  { %731 = vmatprep.subr.mxu0 %v441_v5 }
 0x16b   :  { %732 = vmatpush3.msra.mxu0 %v441_v5 }
 0x16c   :  { %733 = vmatprep.subr.mxu0 %v440_v6 }
 0x16d   :  { %734 = vmatpush3.msra.mxu0 %v440_v6 }
 0x16e   :  { %735 = vmatprep.subr.mxu0 %v439_v14 }
 0x16f   :  { %736 = vmatpush3.msra.mxu0 %v439_v14 }
 0x170   :  { %737 = vmatprep.subr.mxu0 %v438_v15 }
 0x171   :  { %738 = vmatpush3.msra.mxu0 %v438_v15 }
 0x172   :  { %739 = vmatprep.subr.mxu0 %v437_v16 }
 0x173   :  { %740 = vmatpush3.msra.mxu0 %v437_v16 }
 0x174   :  { %741 = vmatprep.subr.mxu0 %v436_v17 }
 0x175   :  { %742 = vmatpush3.msra.mxu0 %v436_v17 }
 0x216   :  { %v675_v8 = vpop.f32.mrf.mxu0 }
 0x217   :  { %v331_v9 = vadd.f32 %v675_v8, %v562_v7 }
 0x218   :  { %v325_v10 = vpop.f32.mrf.mxu0 }
 0x219   :  { %v326_v11 = vadd.f32 %v562_v7, %v325_v10  ;;  %v335_v13 = vmax.f32 %v331_v9, 0.0 }
 0x21b   :  { %v334_v12 = vmax.f32 %v326_v11, 0.0 }
 0x21d   :  { %708 = vmatprep.mubr.f32.mxu1 %v334_v12 }
 0x21e   :  { %709 = vmatmul.mubr.f32.vlgmr.msra.gmra.mxu1 %v335_v13 }
 0x2de   :  { %v710_v19 = vpop.f32.mrf.mxu1 }
 0x2df   :  { %v431_v20 = vadd.f32 %v710_v19, %v563_v18 }
 0x2e0   :  { %v425_v21 = vpop.f32.mrf.mxu1 }
 0x2e1   :  { %v426_v22 = vadd.f32 %v563_v18, %v425_v21  ;;  %v435_v24 = vmax.f32 %v431_v20, 0.0 }
 0x2e3   :  { %v434_v23 = vmax.f32 %v426_v22, 0.0 }
 0x2e5   :  { %743 = vmatprep.mubr.f32.mxu0 %v434_v23 }
 0x2e6   :  { %744 = vmatmul.mubr.f32.vlgmr.msra.gmra.mxu0 %v435_v24 }
 0x3a6   :  { %v745_v26 = vpop.f32.mrf.mxu0 }
 0x3a7   :  { %v531_v27 = vadd.f32 %v745_v26, %v564_v25 }
 0x3a8   :  { %v525_v28 = vpop.f32.mrf.mxu0 }
 0x3a9   :  { %v535_v29 = vmax.f32 %v531_v27, 0.0  ;;  %v526_v30 = vadd.f32 %v564_v25, %v525_v28 }
 0x3ab   :  { %538 = vst.msk [vmem:[#allocation2 + $0x8] sm:$0xff] %vm536_vm4, %v535_v29  ;;  %v534_v31 = vmax.f32 %v526_v30, 0.0 }
 0x3ad   :  { %537 = vst.msk [vmem:[#allocation2] sm:$0xff] %vm536_vm4, %v534_v31 }
 0x3ae   :  { %763 = shalt.err (!%p760_p4)
}
 0x3af   :  { %s777_s10 = smov 128   ;;  %s778_s17 = smov 8  }
 0x3b0   :  { %550 = dma.vmem_to_hbm [thread:$0]  %s545_s16, 256, %s1033_s11, [#allocation3], %s777_s10, %s777_s10, %s778_s17  }
 0x3b1   :  { %772 = dma.done.wait [#allocation3], 256  }
 0x3b2   :  { %773 = vsyncadd [#allocation3], 4294967040 }
 0x3b3   :  { %554 = vsyncpa [#allocation3], 1 }

</bundles_post_ra>
